<compile_context>
chip_gen: v6e
topology: v6e:2x2x1
jax: 0.10.0
libtpu: 0.0.40
codegen_flags: <defaults>
</compile_context>

<pallas_src>
import functools

import jax
import jax.numpy as jnp
from jax import lax
from jax.experimental import pallas as pl
from jax.experimental.pallas import tpu as pltpu

LANE = 128
TR_MAX = 256                     # row-tile cap (multiple of every sublane packing)
TARGET_TILE_BYTES = 8 << 20      # ~8 MiB of input per grid step
CHUNK_ELEMS = 32768              # per-loop-iteration accumulation chunk (~32 vregs f32)
VMEM_LIMIT_BYTES = 32 << 20      # explicit scoped-VMEM limit; safe on v5e/v6e/v7x
_TINY_BYTES = 1 << 20            # below this a standalone kernel launch is overhead

_SUBLANE_PACK = {4: 8, 2: 16, 1: 32}   # itemsize -> minimum sublane packing


def _round_up(n, m):
    return ((n + m - 1) // m) * m


def _avgpool_kernel(x_ref, out_ref, acc_ref, *, inv_l, cw, n_chunks,
                    n_full_last, rem_lanes, n_l_tiles):
    """x_ref: (tr, tl) input tile; out_ref: (tr, 1); acc_ref: (tr, cw) f32."""
    k = pl.program_id(1)
    tr = acc_ref.shape[0]

    @pl.when(k == 0)
    def _init():
        acc_ref[...] = jnp.zeros_like(acc_ref)

    def sum_chunks(n):
        """Sum `n` full (tr, cw) chunks of this tile into one f32 partial."""
        init = jnp.zeros((tr, cw), jnp.float32)
        if n == 0:
            return init

        def body(c, p):
            off = pl.multiple_of(c * cw, cw)
            return p + x_ref[:, pl.ds(off, cw)].astype(jnp.float32)

        return lax.fori_loop(0, n, body, init)

    def accumulate_edge():
        # Last block along L: only n_full_last full chunks are valid, plus
        # rem_lanes valid lanes in the following chunk (the rest of the DMA'd
        # block is garbage from the partial edge transfer -> must be masked).
        p = sum_chunks(n_full_last)
        if rem_lanes:
            v = x_ref[:, n_full_last * cw:(n_full_last + 1) * cw]
            v = v.astype(jnp.float32)
            lane = lax.broadcasted_iota(jnp.int32, (tr, cw), 1)
            p = p + jnp.where(lane < rem_lanes, v, 0.0)
        acc_ref[...] += p

    aligned = (rem_lanes == 0) and (n_full_last == n_chunks)   # L % tl == 0
    if aligned:
        acc_ref[...] += sum_chunks(n_chunks)
    elif n_l_tiles == 1:
        accumulate_edge()
    else:
        @pl.when(k < pl.num_programs(1) - 1)
        def _full():
            acc_ref[...] += sum_chunks(n_chunks)

        @pl.when(k == pl.num_programs(1) - 1)
        def _edge():
            accumulate_edge()

    @pl.when(k == pl.num_programs(1) - 1)
    def _finalize():
        # Single cross-lane (XLU) reduce per row tile, then scale by 1/L.
        row_sum = jnp.sum(acc_ref[...], axis=-1, keepdims=True)   # (tr, 1)
        out_ref[...] = (row_sum * inv_l).astype(out_ref.dtype)


def average_pool(x, *, force_pallas=False):
    """Pallas equivalent of AveragePool.forward: returns (x, mean over last axis)."""
    orig_shape = x.shape
    L = orig_shape[-1]
    lead = orig_shape[:-1]
    R = 1
    for d in lead:
        R *= d

    itemsize = jnp.dtype(x.dtype).itemsize

    # Tiny inputs: let XLA fuse a plain reduction instead of a kernel launch.
    if not force_pallas and R * L * itemsize < _TINY_BYTES:
        return x, jnp.mean(x, axis=-1)

    x2 = x.reshape(R, L)

    # ---- tile selection: byte-based, dtype-aware, no wrapper padding ----
    sub_pack = _SUBLANE_PACK.get(itemsize, 8)
    tr = _round_up(R, sub_pack) if R <= TR_MAX else TR_MAX

    # Per-loop-iteration chunk width: ~CHUNK_ELEMS elements regardless of tr
    # (keeps vector work per fori_loop step fat enough to hide loop control),
    # capped so tiny L doesn't inflate it.
    cw = _round_up(max(LANE, CHUNK_ELEMS // tr), LANE)
    cw = min(cw, _round_up(L, LANE))

    # L tile: a multiple of cw targeting ~TARGET_TILE_BYTES of input per step.
    tl_target = max(cw, (TARGET_TILE_BYTES // (tr * itemsize)) // cw * cw)
    tl = min(_round_up(L, cw), tl_target)

    n_row_tiles = pl.cdiv(R, tr)
    n_l_tiles = pl.cdiv(L, tl)
    n_chunks = tl // cw

    l_rem = L % tl
    if l_rem == 0:
        n_full_last, rem_lanes = n_chunks, 0
    else:
        n_full_last, rem_lanes = l_rem // cw, l_rem % cw

    kernel = functools.partial(
        _avgpool_kernel, inv_l=float(1.0 / L), cw=cw, n_chunks=n_chunks,
        n_full_last=n_full_last, rem_lanes=rem_lanes, n_l_tiles=n_l_tiles)

    out = pl.pallas_call(
        kernel,
        out_shape=jax.ShapeDtypeStruct((R, 1), x.dtype),
        grid_spec=pltpu.PrefetchScalarGridSpec(
            num_scalar_prefetch=0,
            grid=(n_row_tiles, n_l_tiles),          # reduction axis last
            in_specs=[pl.BlockSpec((tr, tl), lambda i, k: (i, k))],
            out_specs=pl.BlockSpec((tr, 1), lambda i, k: (i, 0)),
            scratch_shapes=[pltpu.VMEM((tr, cw), jnp.float32)],
        ),
        compiler_params=pltpu.CompilerParams(
            dimension_semantics=("parallel", "arbitrary"),
            vmem_limit_bytes=VMEM_LIMIT_BYTES),
        cost_estimate=pl.CostEstimate(
            flops=R * L,
            transcendentals=0,
            bytes_accessed=R * L * itemsize + R * itemsize),
    )(x2)

    mean = out[:, 0].reshape(lead)
    # First returned value is the unmodified input, exactly as in the module.
    return x, mean


if __name__ == "__main__":
    key = jax.random.PRNGKey(0)
    # Small shapes consistent with AvgPool1d input: (batch=2, channels=4, signal=16)
    x = jax.random.normal(key, (2, 4, 16), dtype=jnp.float32)

    # force_pallas=True so the Pallas kernel path is exercised even at toy size.
    x_out, avg_feature = average_pool(x, force_pallas=True)
    jax.block_until_ready((x_out, avg_feature))

    # Sanity check against plain-JAX reference.
    ref = jnp.mean(x, axis=-1)
    assert x_out.shape == (2, 4, 16)
    assert avg_feature.shape == (2, 4)
    assert jnp.allclose(x_out, x)
    assert jnp.allclose(avg_feature, ref, atol=1e-5, rtol=1e-5)

    print("KERNEL_OK")
</pallas_src>

<mosaic_0001>
module attributes {stable_mosaic.version = 11 : i64} {
  func.func @_avgpool_kernel(%arg0: i32, %arg1: i32, %arg2: memref<8x128xf32, #tpu.memory_space<vmem>>, %arg3: memref<8x1xf32, #tpu.memory_space<vmem>>, %arg4: memref<8x128xf32, #tpu.memory_space<vmem>>) attributes {dimension_semantics = [#tpu.dimension_semantics<parallel>, #tpu.dimension_semantics<arbitrary>], iteration_bounds = array<i64: 1, 1>, scalar_prefetch = 0 : i64, scratch_operands = 1 : i64, tpu.core_type = #tpu.core_type<tc>, window_params = [{transform_indices = @transform_0, window_bounds = array<i64: 8, 128>}, {transform_indices = @transform_1, window_bounds = array<i64: 8, 1>}]} {
    %c0_i32 = arith.constant 0 : i32
    %0 = arith.cmpi eq, %arg1, %c0_i32 : i32
    %1 = arith.extui %0 : i1 to i32
    %c0_i32_0 = arith.constant 0 : i32
    %2 = arith.cmpi ne, %1, %c0_i32_0 : i32
    scf.if %2 {
      %cst_9 = arith.constant 0.000000e+00 : f32
      %17 = vector.broadcast %cst_9 : f32 to vector<8x128xf32>
      %c0_10 = arith.constant 0 : index
      %c0_11 = arith.constant 0 : index
      %18 = vector.load %arg4[%c0_10, %c0_11] : memref<8x128xf32, #tpu.memory_space<vmem>>, vector<8x128xf32>
      tpu.vector_store %arg4[%c0_10, %c0_11], %17 {strides = array<i32>} : memref<8x128xf32, #tpu.memory_space<vmem>>, vector<8x128xf32>,
    } else {
    }
    %cst = arith.constant 0.000000e+00 : f32
    %3 = vector.broadcast %cst : f32 to vector<8x128xf32>
    %c0 = arith.constant 0 : index
    %c0_1 = arith.constant 0 : index
    %4 = vector.load %arg2[%c0, %c0_1] : memref<8x128xf32, #tpu.memory_space<vmem>>, vector<8x128xf32>
    %5 = tpu.iota {dimensions = array<i32: 1>} : vector<8x128xi32>
    %c16_i32 = arith.constant 16 : i32
    %6 = vector.broadcast %c16_i32 : i32 to vector<8x128xi32>
    %7 = arith.cmpi slt, %5, %6 : vector<8x128xi32>
    %cst_2 = arith.constant 0.000000e+00 : f32
    %8 = vector.broadcast %cst_2 : f32 to vector<8x128xf32>
    %9 = arith.select %7, %4, %8 : vector<8x128xi1>, vector<8x128xf32>
    %10 = arith.addf %3, %9 : vector<8x128xf32>
    %c0_3 = arith.constant 0 : index
    %c0_4 = arith.constant 0 : index
    %11 = vector.load %arg4[%c0_3, %c0_4] : memref<8x128xf32, #tpu.memory_space<vmem>>, vector<8x128xf32>
    %12 = arith.addf %11, %10 : vector<8x128xf32>
    %c0_5 = arith.constant 0 : index
    %c0_6 = arith.constant 0 : index
    %13 = vector.load %arg4[%c0_5, %c0_6] : memref<8x128xf32, #tpu.memory_space<vmem>>, vector<8x128xf32>
    tpu.vector_store %arg4[%c0_5, %c0_6], %12 {strides = array<i32>} : memref<8x128xf32, #tpu.memory_space<vmem>>, vector<8x128xf32>,
    %c0_i32_7 = arith.constant 0 : i32
    %14 = arith.cmpi eq, %arg1, %c0_i32_7 : i32
    %15 = arith.extui %14 : i1 to i32
    %c0_i32_8 = arith.constant 0 : i32
    %16 = arith.cmpi ne, %15, %c0_i32_8 : i32
    scf.if %16 {
      %c0_9 = arith.constant 0 : index
      %c0_10 = arith.constant 0 : index
      %17 = vector.load %arg4[%c0_9, %c0_10] : memref<8x128xf32, #tpu.memory_space<vmem>>, vector<8x128xf32>
      %cst_11 = arith.constant dense<0.000000e+00> : vector<8xf32>
      %18 = vector.multi_reduction <add>, %17, %cst_11 [1] : vector<8x128xf32> to vector<8xf32>
      %19 = vector.shape_cast %18 : vector<8xf32> to vector<8x1xf32>
      %cst_12 = arith.constant 6.250000e-02 : f32
      %20 = vector.broadcast %cst_12 : f32 to vector<8x1xf32>
      %21 = arith.mulf %19, %20 : vector<8x1xf32>
      %c0_13 = arith.constant 0 : index
      %c0_14 = arith.constant 0 : index
      %22 = vector.load %arg3[%c0_13, %c0_14] : memref<8x1xf32, #tpu.memory_space<vmem>>, vector<8x1xf32>
      tpu.vector_store %arg3[%c0_13, %c0_14], %21 {strides = array<i32>} : memref<8x1xf32, #tpu.memory_space<vmem>>, vector<8x1xf32>,
    } else {
    }
    return
  }
  func.func @transform_0(%arg0: i32, %arg1: i32) -> (i32, i32) {
    %c0_i32 = arith.constant 0 : i32
    return %arg0, %arg1 : i32, i32
  }
  func.func @transform_1(%arg0: i32, %arg1: i32) -> (i32, i32) {
    %c0_i32 = arith.constant 0 : i32
    %c0_i32_0 = arith.constant 0 : i32
    return %arg0, %c0_i32 : i32, i32
  }
}

</mosaic_0001>

<bundles_post_ra>
// kernel: tpu_custom_call.1
= control target key start
LH: loop header
LB: loop body
LE: loop exit
PB: predicated region body
PF: predicated region fallthrough
CT: control target
= control target key end

     0   :  { %6 = vsyncpa [#allocation4], 0  ;;  %s71_s6 = smov [#allocation3]   ;;  %s88_s0 = inlined_call_operand.hbm [shape: f32[8,16], index: 0, kind: input, shape index: {}]   ;;  %s89_s1 = inlined_call_operand.vmem [shape: f32[8,1], index: 1, kind: output, shape index: {}]  }
   0x1   :  { %s13_s7 = sshll.u32 %s71_s6, 4  ;;  %s14_s7 = int_to_ptr.vmem [resolvable:$true] %s13_s7 }
   0x2   :  { %s57_s8 = scalar_lea.vmem %s14_s7, 128  ;;  %p62_p1 = scmp.lt.s32.totalorder %s14_s7, %s14_s7 }
   0x3   :  { %p58_p0 = scmp.ne.s32.totalorder %s14_s7, %s57_s8  ;;  %p63_p2 = scmp.lt.s32.totalorder %s57_s8, %s57_s8 }
   0x5   :  { %p64_p3 = por %p63_p2, %p62_p1 }
   0x7   :  { %p65_p4 = pnand %p64_p3, %p58_p0 }
   0x9   :  { %68 = shalt.err (!%p65_p4)
}
   0xa   :  { %16 = dma.hbm_to_vmem [thread:$0]  %s88_s0, 128, %s14_s7, [#allocation4]  }
   0xb   :  { %69 = dma.done.wait [#allocation4], 128  }
   0xc   :  { %70 = vsyncadd [#allocation4], 4294967168  ;;  %v26_v0 = vlaneseq  ;;  %v25_v2 = vld [vmem:[#allocation3] sm:$0xff]  ;;  %vm41_vm1 = vcmask 7168  }
   0xe   :  { %v27_v1 = vand.u32 127, %v26_v0 }
  0x10   :  { %vm28_vm0 = vcmp.lt.s32.totalorder %v27_v1, 16 }
  0x11   :  { %v29_v3 = vsel %vm28_vm0, %v25_v2, 0.0 }
  0x12   :  { %38 = vadd.xlane.f32.xlu0 %v29_v3 }
  0x9b   :  { %v39_v4 = vpop.xlane.xlu0 %38 }
  0x9c   :  { %v40_v5 = vmul.f32 0.0625, %v39_v4 }
  0x9e   :  { %42 = vst.msk [vmem:[%s89_s1] sm:$0xff] %vm41_vm1, %v40_v5 }
  0x9f   :  { %47 = vsyncpa [#allocation4], 1 }

</bundles_post_ra>
